<compile_context>
chip_gen: v7x
topology: tpu7x:2x2x1
jax: 0.10.0
libtpu: 0.0.40
codegen_flags: <defaults>
</compile_context>

<pallas_src>
import functools

import jax
import jax.numpy as jnp
from jax import lax
from jax.experimental import pallas as pl
from jax.experimental.pallas import tpu as pltpu

_MIB = 1024 * 1024


def _round_up(x, m):
    return ((x + m - 1) // m) * m


def _vmem_capacity_bytes():
    """Physical per-core VMEM; conservative (v7x, 64 MiB) fallback if query fails."""
    try:
        cap = getattr(pltpu.get_tpu_info(), "vmem_capacity_bytes", None)
        if cap:
            return int(cap)
    except Exception:
        pass
    return 64 * _MIB


def _rmsnorm_kernel(x_ref, w_ref, o_ref, *, eps):
    # x.float(); mean(x^2, -1); rsqrt (EUP); .type_as(x); * weight — all in VMEM.
    x32 = x_ref[...].astype(jnp.float32)
    ms = jnp.mean(x32 * x32, axis=-1, keepdims=True)
    normed = (x32 * lax.rsqrt(ms + eps)).astype(x_ref.dtype)      # .type_as(x)
    o_ref[...] = (normed * w_ref[...]).astype(o_ref.dtype)        # * weight


def rmsnorm(x, weight, eps=1e-6, *, block_rows=None, out_dtype=None,
            donate_input=False):
    """RMSNorm over the last axis of x. Leading dims are flattened to rows.

    out_dtype=None matches PyTorch promotion of (normed.type_as(x) * weight);
    pass out_dtype=x.dtype to cast weight down and halve writeback bytes.
    donate_input=True aliases the output onto x's HBM buffer when legal.
    """
    orig_shape = x.shape
    dim = orig_shape[-1]
    assert weight.shape == (dim,), (weight.shape, dim)

    rows = 1
    for d in orig_shape[:-1]:
        rows *= d
    rows = max(rows, 1)

    x_dtype = jnp.dtype(x.dtype)
    if out_dtype is None:
        out_dtype = jnp.promote_types(x_dtype, weight.dtype)   # PyTorch behavior
    out_dtype = jnp.dtype(out_dtype)

    x2d = x.reshape(rows, dim)
    # Pre-cast the (tiny) weight once in the wrapper; the in-kernel multiply then
    # produces out_dtype directly with numerics identical to PyTorch promotion.
    w2d = weight.astype(out_dtype).reshape(1, dim)

    # ---- Tile sizing: memory-bound kernel => big tiles, few grid steps --------
    vmem_cap = _vmem_capacity_bytes()
    # Sublane packing: 8 rows/vreg for 4-byte, 16 for 2-byte, 32 for 1-byte dtypes.
    min_itemsize = min(x_dtype.itemsize, out_dtype.itemsize)
    packing = max(8, 32 // max(min_itemsize, 1))

    if block_rows is None:
        # ~5% of physical VMEM for the input tile leaves room for double-buffered
        # in + out tiles plus the f32 intermediates (well within v7x's 64 MiB).
        tile_budget = max(1 * _MIB, vmem_cap // 20)
        block_rows = max(packing, tile_budget // (dim * x_dtype.itemsize))
    block_rows = int(block_rows)
    block_rows = max(packing, (block_rows // packing) * packing)
    block_rows = min(block_rows, 1024)                        # bound per-step latency
    block_rows = min(block_rows, _round_up(rows, packing))    # don't exceed the data

    # ---- Tail handling: pad rows up to a multiple of block_rows ---------------
    padded_rows = _round_up(rows, block_rows)
    if padded_rows != rows:
        x2d = jnp.pad(x2d, ((0, padded_rows - rows), (0, 0)))
    grid = (padded_rows // block_rows,)

    # ---- Scoped VMEM: 2x in + 2x out (double-buffered) + weight + f32 temps ----
    in_tile = block_rows * dim * x_dtype.itemsize
    out_tile = block_rows * dim * out_dtype.itemsize
    f32_tmp = block_rows * dim * 4
    needed = 2 * in_tile + 2 * out_tile + dim * out_dtype.itemsize + 2 * f32_tmp
    vmem_limit = max(2 * needed, 24 * _MIB)
    vmem_limit = min(vmem_limit, int(vmem_cap * 0.7))
    vmem_limit = max(vmem_limit, needed + 1 * _MIB)

    aliases = {}
    if donate_input and padded_rows == rows and out_dtype == x_dtype:
        aliases = {0: 0}   # output reuses x's HBM buffer

    out2d = pl.pallas_call(
        functools.partial(_rmsnorm_kernel, eps=eps),
        out_shape=jax.ShapeDtypeStruct((padded_rows, dim), out_dtype),
        grid_spec=pltpu.PrefetchScalarGridSpec(
            num_scalar_prefetch=0,
            grid=grid,
            in_specs=[
                pl.BlockSpec((block_rows, dim), lambda i: (i, 0)),
                pl.BlockSpec((1, dim), lambda i: (0, 0)),   # weight stays resident
            ],
            out_specs=pl.BlockSpec((block_rows, dim), lambda i: (i, 0)),
        ),
        compiler_params=pltpu.CompilerParams(
            dimension_semantics=("parallel",),   # row axis can shard across v7x TCs
            vmem_limit_bytes=int(vmem_limit),
        ),
        input_output_aliases=aliases,
    )(x2d, w2d)

    if padded_rows != rows:
        out2d = out2d[:rows]
    return out2d.reshape(orig_shape)


def rmsnorm_ref(x, weight, eps=1e-6):
    """Pure-JAX reference mirroring the PyTorch forward."""
    x32 = x.astype(jnp.float32)
    normed = x32 * lax.rsqrt(jnp.mean(x32 * x32, axis=-1, keepdims=True) + eps)
    return normed.astype(x.dtype) * weight


if __name__ == "__main__":
    key = jax.random.PRNGKey(0)
    k1, k2, k3 = jax.random.split(key, 3)

    # Case 1: module-faithful init (weight = torch.ones(dim)), f32 activations.
    batch, seq, d_model = 2, 8, 32
    x = jax.random.normal(k1, (batch, seq, d_model), dtype=jnp.float32)
    weight = jnp.ones((d_model,), dtype=jnp.float32)
    out = jax.block_until_ready(rmsnorm(x, weight, eps=1e-6))
    ref = rmsnorm_ref(x, weight, eps=1e-6)
    assert out.shape == x.shape, (out.shape, x.shape)
    assert out.dtype == ref.dtype, (out.dtype, ref.dtype)
    assert jnp.allclose(out, ref, atol=1e-5, rtol=1e-5), "f32 mismatch vs reference"

    # Case 2: bf16 activations, non-trivial f32 weight, rows not divisible by the
    # tile (exercises the padded-tail path and bf16 sublane packing).
    b2, s2, d2 = 3, 5, 128
    xb = jax.random.normal(k2, (b2, s2, d2), dtype=jnp.float32).astype(jnp.bfloat16)
    wb = 1.0 + 0.1 * jax.random.normal(k3, (d2,), dtype=jnp.float32)
    outb = jax.block_until_ready(rmsnorm(xb, wb, eps=1e-6))
    refb = rmsnorm_ref(xb, wb, eps=1e-6)
    assert outb.shape == xb.shape and outb.dtype == refb.dtype, (outb.dtype, refb.dtype)
    assert jnp.allclose(outb.astype(jnp.float32), refb.astype(jnp.float32),
                        atol=1e-2, rtol=1e-2), "bf16 mismatch vs reference"

    # Case 3: bandwidth-optimized path — output pinned to x.dtype (bf16 writeback).
    outc = jax.block_until_ready(rmsnorm(xb, wb, eps=1e-6, out_dtype=jnp.bfloat16))
    refc = rmsnorm_ref(xb, wb.astype(jnp.bfloat16), eps=1e-6).astype(jnp.bfloat16)
    assert outc.dtype == jnp.bfloat16
    assert jnp.allclose(outc.astype(jnp.float32), refc.astype(jnp.float32),
                        atol=5e-2, rtol=5e-2), "bf16-out mismatch vs reference"

    print("KERNEL_OK")
</pallas_src>

<mosaic_0001>
module attributes {stable_mosaic.version = 11 : i64} {
  func.func @_rmsnorm_kernel(%arg0: i32, %arg1: memref<16x32xf32, #tpu.memory_space<vmem>>, %arg2: memref<1x32xf32, #tpu.memory_space<vmem>>, %arg3: memref<16x32xf32, #tpu.memory_space<vmem>>) attributes {dimension_semantics = [#tpu.dimension_semantics<parallel>], iteration_bounds = array<i64: 1>, scalar_prefetch = 0 : i64, scratch_operands = 0 : i64, tpu.core_type = #tpu.core_type<tc>, window_params = [{transform_indices = @transform_0, window_bounds = array<i64: 16, 32>}, {pipeline_mode = #tpu.pipeline_mode<synchronous>, transform_indices = @transform_1, window_bounds = array<i64: 1, 32>}, {transform_indices = @transform_2, window_bounds = array<i64: 16, 32>}]} {
    %c0 = arith.constant 0 : index
    %c0_0 = arith.constant 0 : index
    %0 = vector.load %arg1[%c0, %c0_0] : memref<16x32xf32, #tpu.memory_space<vmem>>, vector<16x32xf32>
    %1 = arith.mulf %0, %0 : vector<16x32xf32>
    %cst = arith.constant dense<0.000000e+00> : vector<16xf32>
    %2 = vector.multi_reduction <add>, %1, %cst [1] : vector<16x32xf32> to vector<16xf32>
    %3 = vector.shape_cast %2 : vector<16xf32> to vector<16x1xf32>
    %cst_1 = arith.constant 3.200000e+01 : f32
    %4 = vector.broadcast %cst_1 : f32 to vector<16x1xf32>
    %5 = arith.divf %3, %4 : vector<16x1xf32>
    %cst_2 = arith.constant 9.99999997E-7 : f32
    %6 = vector.broadcast %cst_2 : f32 to vector<16x1xf32>
    %7 = arith.addf %5, %6 : vector<16x1xf32>
    %8 = math.rsqrt %7 : vector<16x1xf32>
    %9 = vector.broadcast %8 : vector<16x1xf32> to vector<16x32xf32>
    %10 = arith.mulf %0, %9 : vector<16x32xf32>
    %c0_3 = arith.constant 0 : index
    %c0_4 = arith.constant 0 : index
    %11 = vector.load %arg2[%c0_3, %c0_4] : memref<1x32xf32, #tpu.memory_space<vmem>>, vector<1x32xf32>
    %12 = vector.broadcast %11 : vector<1x32xf32> to vector<16x32xf32>
    %13 = arith.mulf %10, %12 : vector<16x32xf32>
    %c0_5 = arith.constant 0 : index
    %c0_6 = arith.constant 0 : index
    %14 = vector.load %arg3[%c0_5, %c0_6] : memref<16x32xf32, #tpu.memory_space<vmem>>, vector<16x32xf32>
    tpu.vector_store %arg3[%c0_5, %c0_6], %13 {strides = array<i32>} : memref<16x32xf32, #tpu.memory_space<vmem>>, vector<16x32xf32>,
    return
  }
  func.func @transform_0(%arg0: i32) -> (i32, i32) {
    %c0_i32 = arith.constant 0 : i32
    %c0_i32_0 = arith.constant 0 : i32
    return %arg0, %c0_i32 : i32, i32
  }
  func.func @transform_1(%arg0: i32) -> (i32, i32) {
    %c0_i32 = arith.constant 0 : i32
    %c0_i32_0 = arith.constant 0 : i32
    %c0_i32_1 = arith.constant 0 : i32
    return %c0_i32, %c0_i32_0 : i32, i32
  }
  func.func @transform_2(%arg0: i32) -> (i32, i32) {
    %c0_i32 = arith.constant 0 : i32
    %c0_i32_0 = arith.constant 0 : i32
    return %arg0, %c0_i32 : i32, i32
  }
}

</mosaic_0001>

<bundles_post_ra>
// kernel: tpu_custom_call.1
= control target key start
LH: loop header
LB: loop body
LE: loop exit
PB: predicated region body
PF: predicated region fallthrough
CT: control target
= control target key end

     0   :  { %7 = vsyncpa [#allocation3], 0  ;;  %s187_s0 = inlined_call_operand.hbm [shape: f32[16,32], index: 0, kind: input, shape index: {}]   ;;  %s188_s1 = inlined_call_operand.vmem [shape: f32[1,32], index: 1, kind: input, shape index: {}]   ;;  %s189_s2 = inlined_call_operand.hbm [shape: f32[16,32], index: 2, kind: output, shape index: {}]  }
   0x1   :  { %8 = vsyncpa [#allocation4], 0  ;;  %s131_s9 = smov [#allocation2]   ;;  %s83_s13 = scalar_lea.hbm %s187_s0, 256 }
   0x2   :  { %s14_s10 = sshll.u32 %s131_s9, 4  ;;  %p84_p0 = scmp.ne.s32.totalorder %s187_s0, %s83_s13  ;;  %s15_s10 = int_to_ptr.vmem [resolvable:$true] %s14_s10 }
   0x3   :  { %p87_p1 = scmp.lt.u32.totalorder %s83_s13, %s187_s0 }
   0x5   :  { %p89_p2 = pnand %p87_p1, %p84_p0 }
   0x7   :  { %92 = shalt.err (!%p89_p2)
}
   0x8   :  { %s93_s18 = scalar_lea.vmem %s15_s10, 256  ;;  %p98_p4 = scmp.lt.s32.totalorder %s15_s10, %s15_s10 }
   0x9   :  { %p94_p3 = scmp.ne.s32.totalorder %s15_s10, %s93_s18  ;;  %p99_p5 = scmp.lt.s32.totalorder %s93_s18, %s93_s18 }
   0xb   :  { %p100_p6 = por %p99_p5, %p98_p4 }
   0xd   :  { %p101_p7 = pnand %p100_p6, %p94_p3 }
   0xf   :  { %104 = shalt.err (!%p101_p7)
}
  0x10   :  { %s132_s19 = smov 128   ;;  %s133_s20 = smov 8  }
  0x11   :  { %20 = dma.hbm_to_vmem [thread:$0]  %s187_s0, 256, %s15_s10, [#allocation3], %s132_s19, %s132_s19, %s133_s20  }
  0x12   :  { %127 = dma.done.wait [#allocation3], 256  }
  0x13   :  { %128 = vsyncadd [#allocation3], 4294967040  ;;  %v26_v0 = vld [vmem:[#allocation2] sm:$0xff]  ;;  %vm30_vm0 = vcmask 261120   ;;  %v27_v1 = vld [vmem:[#allocation2 + $0x8] sm:$0xff]  ;;  %s134_s24 = smov [#allocation5]  }
  0x14   :  { %v28_v2 = vmul.f32 %v26_v0, %v26_v0  ;;  %v29_v3 = vmul.f32 %v27_v1, %v27_v1  ;;  %v74_v13 = vld [vmem:[%s188_s1] ss:$0 sm:$0xff]  ;;  %s62_s25 = sshll.u32 %s134_s24, 4  ;;  %s63_s25 = int_to_ptr.vmem [resolvable:$true] %s62_s25 }
  0x15   :  { %s105_s26 = scalar_lea.vmem %s63_s25, 256  ;;  %p110_p9 = scmp.lt.s32.totalorder %s63_s25, %s63_s25 }
  0x16   :  { %v31_v4 = vsel %vm30_vm0, %v28_v2, 0.0  ;;  %v34_v5 = vsel %vm30_vm0, %v29_v3, 0.0  ;;  %p106_p8 = scmp.ne.s32.totalorder %s63_s25, %s105_s26  ;;  %p111_p10 = scmp.lt.s32.totalorder %s105_s26, %s105_s26 }
  0x17   :  { %32 = vadd.xlane.f32.xlu0 %v31_v4 }
  0x18   :  { %p112_p11 = por %p111_p10, %p110_p9 }
  0x1a   :  { %p113_p12 = pnand %p112_p11, %p106_p8 }
  0x1b   :  { %35 = vadd.xlane.f32.xlu0 %v34_v5 }
  0xa4   :  { %v33_v6 = vpop.xlane.xlu0 %32 }
  0xa5   :  { %v38_v7 = vmul.f32 0.03125, %v33_v6 }
  0xa7   :  { %v40_v8 = vadd.f32 1e-06, %v38_v7 }
  0xa8   :  { %v36_v9 = vpop.xlane.xlu0 %35 }
  0xa9   :  { %79 = vrsqrt.f32 %v40_v8  ;;  %v39_v10 = vmul.f32 0.03125, %v36_v9 }
  0xab   :  { %v41_v11 = vadd.f32 1e-06, %v39_v10 }
  0xad   :  { %81 = vrsqrt.f32 %v41_v11 }
  0xb3   :  { %v80_v12 = vpop.eup %79 }
  0xb4   :  { %v44_v14 = vmul.f32 %v80_v12, %v26_v0 }
  0xb6   :  { %v53_v15 = vmul.f32 %v74_v13, %v44_v14 }
  0xb7   :  { %v82_v16 = vpop.eup %81 }
  0xb8   :  { %v45_v17 = vmul.f32 %v82_v16, %v27_v1  ;;  %55 = vst.msk [vmem:[#allocation5] sm:$0xff] %vm30_vm0, %v53_v15 }
  0xba   :  { %v54_v18 = vmul.f32 %v74_v13, %v45_v17 }
  0xbc   :  { %56 = vst.msk [vmem:[#allocation5 + $0x8] sm:$0xff] %vm30_vm0, %v54_v18 }
  0xbd   :  { %116 = shalt.err (!%p113_p12)
}
  0xbe   :  { %s117_s28 = scalar_lea.hbm %s189_s2, 256 }
  0xbf   :  { %p118_p13 = scmp.ne.s32.totalorder %s189_s2, %s117_s28  ;;  %p121_p0 = scmp.lt.u32.totalorder %s117_s28, %s189_s2 }
  0xc1   :  { %p123_p1 = pnand %p121_p0, %p118_p13 }
  0xc3   :  { %126 = shalt.err (!%p123_p1)
}
  0xc4   :  { %68 = dma.vmem_to_hbm [thread:$0]  %s63_s25, 256, %s189_s2, [#allocation4], %s132_s19, %s132_s19, %s133_s20  }
  0xc5   :  { %129 = dma.done.wait [#allocation4], 256  }
  0xc6   :  { %130 = vsyncadd [#allocation4], 4294967040 }
  0xc7   :  { %72 = vsyncpa [#allocation3], 1 }
  0xc8   :  { %73 = vsyncpa [#allocation4], 1 }

</bundles_post_ra>
